<compile_context>
chip_gen: v7x
topology: tpu7x:2x2x1
jax: 0.10.0
libtpu: 0.0.40
codegen_flags: <defaults>
</compile_context>

<pallas_src>
import functools

import jax
import jax.numpy as jnp
from jax.experimental import pallas as pl
from jax.experimental.pallas import tpu as pltpu


def _shift_lanes(a, s):
    """Cyclic shift along the last (lane) axis: result[..., i] = a[..., i - s]."""
    return jnp.concatenate([a[..., -s:], a[..., :-s]], axis=-1)


def _taps_3x3(a, masks, w):
    """9 reflection-padded 3x3 taps of a flat (C, H*W) activation, (ky, kx) order.

    tap[ky*3+kx][c, y*W+x] == reflect_pad(a)[c, y+ky, x+kx]; the cyclic wrap of
    the lane shifts is repaired by the boundary selects (reflection padding).
    """
    row0, rowl, col0, coll = masks
    up = _shift_lanes(a, w)      # a[y-1, x]   (cyclic)
    dn = _shift_lanes(a, -w)     # a[y+1, x]   (cyclic)
    top = jnp.where(row0, dn, up)    # reflect at y == 0   -> a[1, x]
    bot = jnp.where(rowl, up, dn)    # reflect at y == H-1 -> a[H-2, x]
    taps = []
    for b in (top, a, bot):          # ky = 0, 1, 2
        lf = _shift_lanes(b, 1)      # b[y, x-1] (cyclic)
        rt = _shift_lanes(b, -1)     # b[y, x+1] (cyclic)
        taps.append(jnp.where(col0, rt, lf))   # kx = 0, reflect at x == 0
        taps.append(b)                          # kx = 1
        taps.append(jnp.where(coll, lf, rt))   # kx = 2, reflect at x == W-1
    return taps


def _resblk_kernel(x_ref, w1_ref, w2_ref, o_ref, p1_ref, p2_ref, *, h, w):
    # x_ref: (1, Cin, H*W) f32        w1_ref: (Cmid, 9*Cin)  bf16
    # o_ref: (1, Cout, H*W) f32       w2_ref: (Cout, 9*Cmid) bf16
    # p1_ref: (9*Cin, H*W) bf16       p2_ref: (9*Cmid, H*W)  bf16
    _, cin, p = x_ref.shape
    cmid = w1_ref.shape[0]

    pos = jax.lax.broadcasted_iota(jnp.int32, (1, p), 1)
    colx = pos % w
    masks = (pos < w, pos >= p - w, colx == 0, colx == w - 1)

    x = x_ref[0]                                  # (Cin, H*W) f32, stays resident

    # ---- cba_1: reflect-pad taps -> one MXU matmul (K = 9*Cin) -> ReLU ------
    for t, tap in enumerate(_taps_3x3(x, masks, w)):
        p1_ref[t * cin:(t + 1) * cin, :] = tap.astype(jnp.bfloat16)
    y1 = jnp.dot(w1_ref[...], p1_ref[...], preferred_element_type=jnp.float32)
    y1 = jnp.maximum(y1, 0.0)                     # (Cmid, H*W) f32

    # ---- cba_2: reflect-pad taps -> one MXU matmul (K = 9*Cmid) -> residual -
    for t, tap in enumerate(_taps_3x3(y1, masks, w)):
        p2_ref[t * cmid:(t + 1) * cmid, :] = tap.astype(jnp.bfloat16)
    y2 = jnp.dot(w2_ref[...], p2_ref[...], preferred_element_type=jnp.float32)

    o_ref[0] = y2 + x                             # (Cout, H*W) f32, lane-dense store


def res_blk_forward(x_nchw, w1_oihw, w2_oihw):
    """ResBlk.forward. x_nchw: [N, Cin, H, W]; w*: PyTorch OIHW 3x3 conv weights."""
    n, cin, h, w = x_nchw.shape
    cmid = w1_oihw.shape[0]
    cout = w2_oihw.shape[0]
    assert cin == cout, "residual add requires dim_in == dim_out"
    assert tuple(w1_oihw.shape[2:]) == (3, 3) and tuple(w2_oihw.shape[2:]) == (3, 3)
    p = h * w

    # Free reshape (contiguous dims merge): spatial becomes the lane dim.
    x = x_nchw.astype(jnp.float32).reshape(n, cin, p)

    # OIHW -> (O, KH, KW, I) -> [Cout, 9*Cin]; columns ordered (ky, kx, ci) to
    # match the tap row order.  bf16 for the MXU (f32 accumulation).
    w1_mat = jnp.transpose(w1_oihw, (0, 2, 3, 1)).reshape(cmid, 9 * cin).astype(jnp.bfloat16)
    w2_mat = jnp.transpose(w2_oihw, (0, 2, 3, 1)).reshape(cout, 9 * cmid).astype(jnp.bfloat16)

    kernel = functools.partial(_resblk_kernel, h=h, w=w)

    out = pl.pallas_call(
        kernel,
        out_shape=jax.ShapeDtypeStruct((n, cout, p), jnp.float32),
        grid=(n,),
        in_specs=[
            pl.BlockSpec((1, cin, p), lambda i: (i, 0, 0)),       # per-image block
            pl.BlockSpec((cmid, 9 * cin), lambda i: (0, 0)),      # conv1 weights (resident)
            pl.BlockSpec((cout, 9 * cmid), lambda i: (0, 0)),     # conv2 weights (resident)
        ],
        out_specs=pl.BlockSpec((1, cout, p), lambda i: (i, 0, 0)),
        scratch_shapes=[
            pltpu.VMEM((9 * cin, p), jnp.bfloat16),    # conv1 patch matrix
            pltpu.VMEM((9 * cmid, p), jnp.bfloat16),   # conv2 patch matrix
        ],
        compiler_params=pltpu.CompilerParams(
            dimension_semantics=("parallel",)),
    )(x, w1_mat, w2_mat)

    return out.reshape(n, cout, h, w)              # free reshape back to NCHW


def ref_forward(x_nchw, w1_oihw, w2_oihw):
    """Pure-JAX f32 reference matching the PyTorch ResBlk forward."""
    def conv(x, w):
        xp = jnp.pad(x, ((0, 0), (0, 0), (1, 1), (1, 1)), mode="reflect")
        return jax.lax.conv_general_dilated(
            xp, w, window_strides=(1, 1), padding="VALID",
            dimension_numbers=("NCHW", "OIHW", "NCHW"),
            precision=jax.lax.Precision.HIGHEST)
    y = jax.nn.relu(conv(x_nchw, w1_oihw))
    y = conv(y, w2_oihw)
    return y + x_nchw


if __name__ == "__main__":
    # ResBlk(dim_in=4, dim_out=4, dim_intermediate=8, ks=3, s=1)
    N, C_IN, H, W = 2, 4, 16, 16
    C_MID = 8
    KS = 3

    key = jax.random.PRNGKey(0)
    kx, k1, k2 = jax.random.split(key, 3)
    x = jax.random.normal(kx, (N, C_IN, H, W), dtype=jnp.float32)
    # PyTorch Conv2d weight layout: [out_channels, in_channels, kh, kw], bias=None
    w1 = 0.1 * jax.random.normal(k1, (C_MID, C_IN, KS, KS), dtype=jnp.float32)
    w2 = 0.1 * jax.random.normal(k2, (C_IN, C_MID, KS, KS), dtype=jnp.float32)

    out = jax.block_until_ready(res_blk_forward(x, w1, w2))
    ref = jax.block_until_ready(ref_forward(x, w1, w2))

    assert out.shape == (N, C_IN, H, W)
    # Tolerance sized for bf16 MXU inputs (f32 accumulation) vs. the f32 reference.
    assert jnp.allclose(out, ref, rtol=1e-2, atol=1e-2), (
        float(jnp.max(jnp.abs(out - ref))))

    print("KERNEL_OK")
</pallas_src>

<mosaic_0001>
module attributes {stable_mosaic.version = 11 : i64} {
  func.func @_resblk_kernel(%arg0: i32, %arg1: memref<1x4x256xf32, #tpu.memory_space<vmem>>, %arg2: memref<8x36xbf16, #tpu.memory_space<vmem>>, %arg3: memref<4x72xbf16, #tpu.memory_space<vmem>>, %arg4: memref<1x4x256xf32, #tpu.memory_space<vmem>>, %arg5: memref<36x256xbf16, #tpu.memory_space<vmem>>, %arg6: memref<72x256xbf16, #tpu.memory_space<vmem>>) attributes {dimension_semantics = [#tpu.dimension_semantics<parallel>], iteration_bounds = array<i64: 2>, scalar_prefetch = 0 : i64, scratch_operands = 2 : i64, tpu.core_type = #tpu.core_type<tc>, window_params = [{transform_indices = @transform_0, window_bounds = array<i64: 1, 4, 256>}, {pipeline_mode = #tpu.pipeline_mode<synchronous>, transform_indices = @transform_1, window_bounds = array<i64: 8, 36>}, {pipeline_mode = #tpu.pipeline_mode<synchronous>, transform_indices = @transform_2, window_bounds = array<i64: 4, 72>}, {transform_indices = @transform_3, window_bounds = array<i64: 1, 4, 256>}]} {
    %0 = tpu.iota {dimensions = array<i32: 1>} : vector<1x256xi32>
    %c16_i32 = arith.constant 16 : i32
    %c0_i32 = arith.constant 0 : i32
    %1 = arith.cmpi eq, %c16_i32, %c0_i32 : i32
    %c1_i32 = arith.constant 1 : i32
    %2 = arith.select %1, %c1_i32, %c16_i32 : i32
    %3 = vector.broadcast %2 : i32 to vector<1x256xi32>
    %4 = arith.remsi %0, %3 : vector<1x256xi32>
    %c0_i32_0 = arith.constant 0 : i32
    %5 = vector.broadcast %c0_i32_0 : i32 to vector<1x256xi32>
    %6 = arith.cmpi ne, %4, %5 : vector<1x256xi32>
    %c0_i32_1 = arith.constant 0 : i32
    %7 = vector.broadcast %c0_i32_1 : i32 to vector<1x256xi32>
    %8 = arith.cmpi slt, %4, %7 : vector<1x256xi32>
    %c0_i32_2 = arith.constant 0 : i32
    %9 = arith.cmpi slt, %2, %c0_i32_2 : i32
    %10 = vector.broadcast %9 : i1 to vector<1x256xi1>
    %11 = vector.broadcast %10 : vector<1x256xi1> to vector<1x256xi1>
    %12 = arith.xori %8, %11 : vector<1x256xi1>
    %13 = arith.andi %12, %6 : vector<1x256xi1>
    %14 = vector.broadcast %2 : i32 to vector<1x256xi32>
    %15 = arith.addi %4, %14 : vector<1x256xi32>
    %16 = arith.select %13, %15, %4 : vector<1x256xi1>, vector<1x256xi32>
    %c16_i32_3 = arith.constant 16 : i32
    %17 = vector.broadcast %c16_i32_3 : i32 to vector<1x256xi32>
    %18 = arith.cmpi slt, %0, %17 : vector<1x256xi32>
    %c240_i32 = arith.constant 240 : i32
    %19 = vector.broadcast %c240_i32 : i32 to vector<1x256xi32>
    %20 = arith.cmpi sge, %0, %19 : vector<1x256xi32>
    %c0_i32_4 = arith.constant 0 : i32
    %21 = vector.broadcast %c0_i32_4 : i32 to vector<1x256xi32>
    %22 = arith.cmpi eq, %16, %21 : vector<1x256xi32>
    %c15_i32 = arith.constant 15 : i32
    %23 = vector.broadcast %c15_i32 : i32 to vector<1x256xi32>
    %24 = arith.cmpi eq, %16, %23 : vector<1x256xi32>
    %c0 = arith.constant 0 : index
    %c0_5 = arith.constant 0 : index
    %c0_6 = arith.constant 0 : index
    %25 = vector.load %arg1[%c0, %c0_5, %c0_6] : memref<1x4x256xf32, #tpu.memory_space<vmem>>, vector<1x4x256xf32>
    %26 = vector.shape_cast %25 : vector<1x4x256xf32> to vector<4x256xf32>
    %27 = vector.extract_strided_slice %26 {offsets = [0, 240], sizes = [4, 16], strides = [1, 1]} : vector<4x256xf32> to vector<4x16xf32>
    %28 = vector.extract_strided_slice %26 {offsets = [0, 0], sizes = [4, 240], strides = [1, 1]} : vector<4x256xf32> to vector<4x240xf32>
    %29 = tpu.concatenate %27, %28 in 1 : vector<4x16xf32>, vector<4x240xf32> -> vector<4x256xf32>
    %30 = vector.extract_strided_slice %26 {offsets = [0, 16], sizes = [4, 240], strides = [1, 1]} : vector<4x256xf32> to vector<4x240xf32>
    %31 = vector.extract_strided_slice %26 {offsets = [0, 0], sizes = [4, 16], strides = [1, 1]} : vector<4x256xf32> to vector<4x16xf32>
    %32 = tpu.concatenate %30, %31 in 1 : vector<4x240xf32>, vector<4x16xf32> -> vector<4x256xf32>
    %33 = vector.shape_cast %18 : vector<1x256xi1> to vector<1x256xi1>
    %34 = vector.broadcast %33 : vector<1x256xi1> to vector<4x256xi1>
    %35 = arith.select %34, %32, %29 : vector<4x256xi1>, vector<4x256xf32>
    %36 = vector.shape_cast %20 : vector<1x256xi1> to vector<1x256xi1>
    %37 = vector.broadcast %36 : vector<1x256xi1> to vector<4x256xi1>
    %38 = arith.select %37, %29, %32 : vector<4x256xi1>, vector<4x256xf32>
    %39 = vector.extract_strided_slice %35 {offsets = [0, 255], sizes = [4, 1], strides = [1, 1]} : vector<4x256xf32> to vector<4x1xf32>
    %40 = vector.extract_strided_slice %35 {offsets = [0, 0], sizes = [4, 255], strides = [1, 1]} : vector<4x256xf32> to vector<4x255xf32>
    %41 = tpu.concatenate %39, %40 in 1 : vector<4x1xf32>, vector<4x255xf32> -> vector<4x256xf32>
    %42 = vector.extract_strided_slice %35 {offsets = [0, 1], sizes = [4, 255], strides = [1, 1]} : vector<4x256xf32> to vector<4x255xf32>
    %43 = vector.extract_strided_slice %35 {offsets = [0, 0], sizes = [4, 1], strides = [1, 1]} : vector<4x256xf32> to vector<4x1xf32>
    %44 = tpu.concatenate %42, %43 in 1 : vector<4x255xf32>, vector<4x1xf32> -> vector<4x256xf32>
    %45 = vector.shape_cast %22 : vector<1x256xi1> to vector<1x256xi1>
    %46 = vector.broadcast %45 : vector<1x256xi1> to vector<4x256xi1>
    %47 = arith.select %46, %44, %41 : vector<4x256xi1>, vector<4x256xf32>
    %48 = vector.shape_cast %24 : vector<1x256xi1> to vector<1x256xi1>
    %49 = vector.broadcast %48 : vector<1x256xi1> to vector<4x256xi1>
    %50 = arith.select %49, %41, %44 : vector<4x256xi1>, vector<4x256xf32>
    %51 = vector.extract_strided_slice %26 {offsets = [0, 255], sizes = [4, 1], strides = [1, 1]} : vector<4x256xf32> to vector<4x1xf32>
    %52 = vector.extract_strided_slice %26 {offsets = [0, 0], sizes = [4, 255], strides = [1, 1]} : vector<4x256xf32> to vector<4x255xf32>
    %53 = tpu.concatenate %51, %52 in 1 : vector<4x1xf32>, vector<4x255xf32> -> vector<4x256xf32>
    %54 = vector.extract_strided_slice %26 {offsets = [0, 1], sizes = [4, 255], strides = [1, 1]} : vector<4x256xf32> to vector<4x255xf32>
    %55 = vector.extract_strided_slice %26 {offsets = [0, 0], sizes = [4, 1], strides = [1, 1]} : vector<4x256xf32> to vector<4x1xf32>
    %56 = tpu.concatenate %54, %55 in 1 : vector<4x255xf32>, vector<4x1xf32> -> vector<4x256xf32>
    %57 = vector.shape_cast %22 : vector<1x256xi1> to vector<1x256xi1>
    %58 = vector.broadcast %57 : vector<1x256xi1> to vector<4x256xi1>
    %59 = arith.select %58, %56, %53 : vector<4x256xi1>, vector<4x256xf32>
    %60 = vector.shape_cast %24 : vector<1x256xi1> to vector<1x256xi1>
    %61 = vector.broadcast %60 : vector<1x256xi1> to vector<4x256xi1>
    %62 = arith.select %61, %53, %56 : vector<4x256xi1>, vector<4x256xf32>
    %63 = vector.extract_strided_slice %38 {offsets = [0, 255], sizes = [4, 1], strides = [1, 1]} : vector<4x256xf32> to vector<4x1xf32>
    %64 = vector.extract_strided_slice %38 {offsets = [0, 0], sizes = [4, 255], strides = [1, 1]} : vector<4x256xf32> to vector<4x255xf32>
    %65 = tpu.concatenate %63, %64 in 1 : vector<4x1xf32>, vector<4x255xf32> -> vector<4x256xf32>
    %66 = vector.extract_strided_slice %38 {offsets = [0, 1], sizes = [4, 255], strides = [1, 1]} : vector<4x256xf32> to vector<4x255xf32>
    %67 = vector.extract_strided_slice %38 {offsets = [0, 0], sizes = [4, 1], strides = [1, 1]} : vector<4x256xf32> to vector<4x1xf32>
    %68 = tpu.concatenate %66, %67 in 1 : vector<4x255xf32>, vector<4x1xf32> -> vector<4x256xf32>
    %69 = vector.shape_cast %22 : vector<1x256xi1> to vector<1x256xi1>
    %70 = vector.broadcast %69 : vector<1x256xi1> to vector<4x256xi1>
    %71 = arith.select %70, %68, %65 : vector<4x256xi1>, vector<4x256xf32>
    %72 = vector.shape_cast %24 : vector<1x256xi1> to vector<1x256xi1>
    %73 = vector.broadcast %72 : vector<1x256xi1> to vector<4x256xi1>
    %74 = arith.select %73, %65, %68 : vector<4x256xi1>, vector<4x256xf32>
    %75 = arith.truncf %47 : vector<4x256xf32> to vector<4x256xbf16>
    %c0_7 = arith.constant 0 : index
    %c0_8 = arith.constant 0 : index
    %76 = vector.load %arg5[%c0_7, %c0_8] : memref<36x256xbf16, #tpu.memory_space<vmem>>, vector<4x256xbf16>
    tpu.vector_store %arg5[%c0_7, %c0_8], %75 {strides = array<i32>} : memref<36x256xbf16, #tpu.memory_space<vmem>>, vector<4x256xbf16>,
    %77 = arith.truncf %35 : vector<4x256xf32> to vector<4x256xbf16>
    %c4 = arith.constant 4 : index
    %c0_9 = arith.constant 0 : index
    %78 = vector.load %arg5[%c4, %c0_9] : memref<36x256xbf16, #tpu.memory_space<vmem>>, vector<4x256xbf16>
    tpu.vector_store %arg5[%c4, %c0_9], %77 {strides = array<i32>} : memref<36x256xbf16, #tpu.memory_space<vmem>>, vector<4x256xbf16>,
    %79 = arith.truncf %50 : vector<4x256xf32> to vector<4x256xbf16>
    %c8 = arith.constant 8 : index
    %c0_10 = arith.constant 0 : index
    %80 = vector.load %arg5[%c8, %c0_10] : memref<36x256xbf16, #tpu.memory_space<vmem>>, vector<4x256xbf16>
    tpu.vector_store %arg5[%c8, %c0_10], %79 {strides = array<i32>} : memref<36x256xbf16, #tpu.memory_space<vmem>>, vector<4x256xbf16>,
    %81 = arith.truncf %59 : vector<4x256xf32> to vector<4x256xbf16>
    %c12 = arith.constant 12 : index
    %c0_11 = arith.constant 0 : index
    %82 = vector.load %arg5[%c12, %c0_11] : memref<36x256xbf16, #tpu.memory_space<vmem>>, vector<4x256xbf16>
    tpu.vector_store %arg5[%c12, %c0_11], %81 {strides = array<i32>} : memref<36x256xbf16, #tpu.memory_space<vmem>>, vector<4x256xbf16>,
    %83 = arith.truncf %26 : vector<4x256xf32> to vector<4x256xbf16>
    %c16 = arith.constant 16 : index
    %c0_12 = arith.constant 0 : index
    %84 = vector.load %arg5[%c16, %c0_12] : memref<36x256xbf16, #tpu.memory_space<vmem>>, vector<4x256xbf16>
    tpu.vector_store %arg5[%c16, %c0_12], %83 {strides = array<i32>} : memref<36x256xbf16, #tpu.memory_space<vmem>>, vector<4x256xbf16>,
    %85 = arith.truncf %62 : vector<4x256xf32> to vector<4x256xbf16>
    %c20 = arith.constant 20 : index
    %c0_13 = arith.constant 0 : index
    %86 = vector.load %arg5[%c20, %c0_13] : memref<36x256xbf16, #tpu.memory_space<vmem>>, vector<4x256xbf16>
    tpu.vector_store %arg5[%c20, %c0_13], %85 {strides = array<i32>} : memref<36x256xbf16, #tpu.memory_space<vmem>>, vector<4x256xbf16>,
    %87 = arith.truncf %71 : vector<4x256xf32> to vector<4x256xbf16>
    %c24 = arith.constant 24 : index
    %c0_14 = arith.constant 0 : index
    %88 = vector.load %arg5[%c24, %c0_14] : memref<36x256xbf16, #tpu.memory_space<vmem>>, vector<4x256xbf16>
    tpu.vector_store %arg5[%c24, %c0_14], %87 {strides = array<i32>} : memref<36x256xbf16, #tpu.memory_space<vmem>>, vector<4x256xbf16>,
    %89 = arith.truncf %38 : vector<4x256xf32> to vector<4x256xbf16>
    %c28 = arith.constant 28 : index
    %c0_15 = arith.constant 0 : index
    %90 = vector.load %arg5[%c28, %c0_15] : memref<36x256xbf16, #tpu.memory_space<vmem>>, vector<4x256xbf16>
    tpu.vector_store %arg5[%c28, %c0_15], %89 {strides = array<i32>} : memref<36x256xbf16, #tpu.memory_space<vmem>>, vector<4x256xbf16>,
    %91 = arith.truncf %74 : vector<4x256xf32> to vector<4x256xbf16>
    %c32 = arith.constant 32 : index
    %c0_16 = arith.constant 0 : index
    %92 = vector.load %arg5[%c32, %c0_16] : memref<36x256xbf16, #tpu.memory_space<vmem>>, vector<4x256xbf16>
    tpu.vector_store %arg5[%c32, %c0_16], %91 {strides = array<i32>} : memref<36x256xbf16, #tpu.memory_space<vmem>>, vector<4x256xbf16>,
    %c0_17 = arith.constant 0 : index
    %c0_18 = arith.constant 0 : index
    %93 = vector.load %arg2[%c0_17, %c0_18] : memref<8x36xbf16, #tpu.memory_space<vmem>>, vector<8x36xbf16>
    %c0_19 = arith.constant 0 : index
    %c0_20 = arith.constant 0 : index
    %94 = vector.load %arg5[%c0_19, %c0_20] : memref<36x256xbf16, #tpu.memory_space<vmem>>, vector<36x256xbf16>
    %cst = arith.constant dense<0.000000e+00> : vector<8x256xf32>
    %95 = tpu.matmul %93, %94, %cst {dimension_numbers = #tpu.dot_dimension_numbers<[1], [0], [0], [1], [0, 0, 1, 1], [], []>} : vector<8x36xbf16>, vector<36x256xbf16>, vector<8x256xf32> -> vector<8x256xf32>
    %cst_21 = arith.constant 0.000000e+00 : f32
    %96 = vector.broadcast %cst_21 : f32 to vector<8x256xf32>
    %97 = arith.maximumf %95, %96 : vector<8x256xf32>
    %98 = vector.extract_strided_slice %97 {offsets = [0, 240], sizes = [8, 16], strides = [1, 1]} : vector<8x256xf32> to vector<8x16xf32>
    %99 = vector.extract_strided_slice %97 {offsets = [0, 0], sizes = [8, 240], strides = [1, 1]} : vector<8x256xf32> to vector<8x240xf32>
    %100 = tpu.concatenate %98, %99 in 1 : vector<8x16xf32>, vector<8x240xf32> -> vector<8x256xf32>
    %101 = vector.extract_strided_slice %97 {offsets = [0, 16], sizes = [8, 240], strides = [1, 1]} : vector<8x256xf32> to vector<8x240xf32>
    %102 = vector.extract_strided_slice %97 {offsets = [0, 0], sizes = [8, 16], strides = [1, 1]} : vector<8x256xf32> to vector<8x16xf32>
    %103 = tpu.concatenate %101, %102 in 1 : vector<8x240xf32>, vector<8x16xf32> -> vector<8x256xf32>
    %104 = vector.shape_cast %18 : vector<1x256xi1> to vector<1x256xi1>
    %105 = vector.broadcast %104 : vector<1x256xi1> to vector<8x256xi1>
    %106 = arith.select %105, %103, %100 : vector<8x256xi1>, vector<8x256xf32>
    %107 = vector.shape_cast %20 : vector<1x256xi1> to vector<1x256xi1>
    %108 = vector.broadcast %107 : vector<1x256xi1> to vector<8x256xi1>
    %109 = arith.select %108, %100, %103 : vector<8x256xi1>, vector<8x256xf32>
    %110 = vector.extract_strided_slice %106 {offsets = [0, 255], sizes = [8, 1], strides = [1, 1]} : vector<8x256xf32> to vector<8x1xf32>
    %111 = vector.extract_strided_slice %106 {offsets = [0, 0], sizes = [8, 255], strides = [1, 1]} : vector<8x256xf32> to vector<8x255xf32>
    %112 = tpu.concatenate %110, %111 in 1 : vector<8x1xf32>, vector<8x255xf32> -> vector<8x256xf32>
    %113 = vector.extract_strided_slice %106 {offsets = [0, 1], sizes = [8, 255], strides = [1, 1]} : vector<8x256xf32> to vector<8x255xf32>
    %114 = vector.extract_strided_slice %106 {offsets = [0, 0], sizes = [8, 1], strides = [1, 1]} : vector<8x256xf32> to vector<8x1xf32>
    %115 = tpu.concatenate %113, %114 in 1 : vector<8x255xf32>, vector<8x1xf32> -> vector<8x256xf32>
    %116 = vector.shape_cast %22 : vector<1x256xi1> to vector<1x256xi1>
    %117 = vector.broadcast %116 : vector<1x256xi1> to vector<8x256xi1>
    %118 = arith.select %117, %115, %112 : vector<8x256xi1>, vector<8x256xf32>
    %119 = vector.shape_cast %24 : vector<1x256xi1> to vector<1x256xi1>
    %120 = vector.broadcast %119 : vector<1x256xi1> to vector<8x256xi1>
    %121 = arith.select %120, %112, %115 : vector<8x256xi1>, vector<8x256xf32>
    %122 = vector.extract_strided_slice %97 {offsets = [0, 255], sizes = [8, 1], strides = [1, 1]} : vector<8x256xf32> to vector<8x1xf32>
    %123 = vector.extract_strided_slice %97 {offsets = [0, 0], sizes = [8, 255], strides = [1, 1]} : vector<8x256xf32> to vector<8x255xf32>
    %124 = tpu.concatenate %122, %123 in 1 : vector<8x1xf32>, vector<8x255xf32> -> vector<8x256xf32>
    %125 = vector.extract_strided_slice %97 {offsets = [0, 1], sizes = [8, 255], strides = [1, 1]} : vector<8x256xf32> to vector<8x255xf32>
    %126 = vector.extract_strided_slice %97 {offsets = [0, 0], sizes = [8, 1], strides = [1, 1]} : vector<8x256xf32> to vector<8x1xf32>
    %127 = tpu.concatenate %125, %126 in 1 : vector<8x255xf32>, vector<8x1xf32> -> vector<8x256xf32>
    %128 = vector.shape_cast %22 : vector<1x256xi1> to vector<1x256xi1>
    %129 = vector.broadcast %128 : vector<1x256xi1> to vector<8x256xi1>
    %130 = arith.select %129, %127, %124 : vector<8x256xi1>, vector<8x256xf32>
    %131 = vector.shape_cast %24 : vector<1x256xi1> to vector<1x256xi1>
    %132 = vector.broadcast %131 : vector<1x256xi1> to vector<8x256xi1>
    %133 = arith.select %132, %124, %127 : vector<8x256xi1>, vector<8x256xf32>
    %134 = vector.extract_strided_slice %109 {offsets = [0, 255], sizes = [8, 1], strides = [1, 1]} : vector<8x256xf32> to vector<8x1xf32>
    %135 = vector.extract_strided_slice %109 {offsets = [0, 0], sizes = [8, 255], strides = [1, 1]} : vector<8x256xf32> to vector<8x255xf32>
    %136 = tpu.concatenate %134, %135 in 1 : vector<8x1xf32>, vector<8x255xf32> -> vector<8x256xf32>
    %137 = vector.extract_strided_slice %109 {offsets = [0, 1], sizes = [8, 255], strides = [1, 1]} : vector<8x256xf32> to vector<8x255xf32>
    %138 = vector.extract_strided_slice %109 {offsets = [0, 0], sizes = [8, 1], strides = [1, 1]} : vector<8x256xf32> to vector<8x1xf32>
    %139 = tpu.concatenate %137, %138 in 1 : vector<8x255xf32>, vector<8x1xf32> -> vector<8x256xf32>
    %140 = vector.shape_cast %22 : vector<1x256xi1> to vector<1x256xi1>
    %141 = vector.broadcast %140 : vector<1x256xi1> to vector<8x256xi1>
    %142 = arith.select %141, %139, %136 : vector<8x256xi1>, vector<8x256xf32>
    %143 = vector.shape_cast %24 : vector<1x256xi1> to vector<1x256xi1>
    %144 = vector.broadcast %143 : vector<1x256xi1> to vector<8x256xi1>
    %145 = arith.select %144, %136, %139 : vector<8x256xi1>, vector<8x256xf32>
    %146 = arith.truncf %118 : vector<8x256xf32> to vector<8x256xbf16>
    %c0_22 = arith.constant 0 : index
    %c0_23 = arith.constant 0 : index
    %147 = vector.load %arg6[%c0_22, %c0_23] : memref<72x256xbf16, #tpu.memory_space<vmem>>, vector<8x256xbf16>
    tpu.vector_store %arg6[%c0_22, %c0_23], %146 {strides = array<i32>} : memref<72x256xbf16, #tpu.memory_space<vmem>>, vector<8x256xbf16>,
    %148 = arith.truncf %106 : vector<8x256xf32> to vector<8x256xbf16>
    %c8_24 = arith.constant 8 : index
    %c0_25 = arith.constant 0 : index
    %149 = vector.load %arg6[%c8_24, %c0_25] : memref<72x256xbf16, #tpu.memory_space<vmem>>, vector<8x256xbf16>
    tpu.vector_store %arg6[%c8_24, %c0_25], %148 {strides = array<i32>} : memref<72x256xbf16, #tpu.memory_space<vmem>>, vector<8x256xbf16>,
    %150 = arith.truncf %121 : vector<8x256xf32> to vector<8x256xbf16>
    %c16_26 = arith.constant 16 : index
    %c0_27 = arith.constant 0 : index
    %151 = vector.load %arg6[%c16_26, %c0_27] : memref<72x256xbf16, #tpu.memory_space<vmem>>, vector<8x256xbf16>
    tpu.vector_store %arg6[%c16_26, %c0_27], %150 {strides = array<i32>} : memref<72x256xbf16, #tpu.memory_space<vmem>>, vector<8x256xbf16>,
    %152 = arith.truncf %130 : vector<8x256xf32> to vector<8x256xbf16>
    %c24_28 = arith.constant 24 : index
    %c0_29 = arith.constant 0 : index
    %153 = vector.load %arg6[%c24_28, %c0_29] : memref<72x256xbf16, #tpu.memory_space<vmem>>, vector<8x256xbf16>
    tpu.vector_store %arg6[%c24_28, %c0_29], %152 {strides = array<i32>} : memref<72x256xbf16, #tpu.memory_space<vmem>>, vector<8x256xbf16>,
    %154 = arith.truncf %97 : vector<8x256xf32> to vector<8x256xbf16>
    %c32_30 = arith.constant 32 : index
    %c0_31 = arith.constant 0 : index
    %155 = vector.load %arg6[%c32_30, %c0_31] : memref<72x256xbf16, #tpu.memory_space<vmem>>, vector<8x256xbf16>
    tpu.vector_store %arg6[%c32_30, %c0_31], %154 {strides = array<i32>} : memref<72x256xbf16, #tpu.memory_space<vmem>>, vector<8x256xbf16>,
    %156 = arith.truncf %133 : vector<8x256xf32> to vector<8x256xbf16>
    %c40 = arith.constant 40 : index
    %c0_32 = arith.constant 0 : index
    %157 = vector.load %arg6[%c40, %c0_32] : memref<72x256xbf16, #tpu.memory_space<vmem>>, vector<8x256xbf16>
    tpu.vector_store %arg6[%c40, %c0_32], %156 {strides = array<i32>} : memref<72x256xbf16, #tpu.memory_space<vmem>>, vector<8x256xbf16>,
    %158 = arith.truncf %142 : vector<8x256xf32> to vector<8x256xbf16>
    %c48 = arith.constant 48 : index
    %c0_33 = arith.constant 0 : index
    %159 = vector.load %arg6[%c48, %c0_33] : memref<72x256xbf16, #tpu.memory_space<vmem>>, vector<8x256xbf16>
    tpu.vector_store %arg6[%c48, %c0_33], %158 {strides = array<i32>} : memref<72x256xbf16, #tpu.memory_space<vmem>>, vector<8x256xbf16>,
    %160 = arith.truncf %109 : vector<8x256xf32> to vector<8x256xbf16>
    %c56 = arith.constant 56 : index
    %c0_34 = arith.constant 0 : index
    %161 = vector.load %arg6[%c56, %c0_34] : memref<72x256xbf16, #tpu.memory_space<vmem>>, vector<8x256xbf16>
    tpu.vector_store %arg6[%c56, %c0_34], %160 {strides = array<i32>} : memref<72x256xbf16, #tpu.memory_space<vmem>>, vector<8x256xbf16>,
    %162 = arith.truncf %145 : vector<8x256xf32> to vector<8x256xbf16>
    %c64 = arith.constant 64 : index
    %c0_35 = arith.constant 0 : index
    %163 = vector.load %arg6[%c64, %c0_35] : memref<72x256xbf16, #tpu.memory_space<vmem>>, vector<8x256xbf16>
    tpu.vector_store %arg6[%c64, %c0_35], %162 {strides = array<i32>} : memref<72x256xbf16, #tpu.memory_space<vmem>>, vector<8x256xbf16>,
    %c0_36 = arith.constant 0 : index
    %c0_37 = arith.constant 0 : index
    %164 = vector.load %arg3[%c0_36, %c0_37] : memref<4x72xbf16, #tpu.memory_space<vmem>>, vector<4x72xbf16>
    %c0_38 = arith.constant 0 : index
    %c0_39 = arith.constant 0 : index
    %165 = vector.load %arg6[%c0_38, %c0_39] : memref<72x256xbf16, #tpu.memory_space<vmem>>, vector<72x256xbf16>
    %cst_40 = arith.constant dense<0.000000e+00> : vector<4x256xf32>
    %166 = tpu.matmul %164, %165, %cst_40 {dimension_numbers = #tpu.dot_dimension_numbers<[1], [0], [0], [1], [0, 0, 1, 1], [], []>} : vector<4x72xbf16>, vector<72x256xbf16>, vector<4x256xf32> -> vector<4x256xf32>
    %167 = arith.addf %166, %26 : vector<4x256xf32>
    %c0_41 = arith.constant 0 : index
    %c0_42 = arith.constant 0 : index
    %c0_43 = arith.constant 0 : index
    %168 = vector.load %arg4[%c0_41, %c0_42, %c0_43] : memref<1x4x256xf32, #tpu.memory_space<vmem>>, vector<1x4x256xf32>
    %169 = vector.shape_cast %168 : vector<1x4x256xf32> to vector<4x256xf32>
    %170 = vector.shape_cast %167 : vector<4x256xf32> to vector<1x4x256xf32>
    tpu.vector_store %arg4[%c0_41, %c0_42, %c0_43], %170 {strides = array<i32>} : memref<1x4x256xf32, #tpu.memory_space<vmem>>, vector<1x4x256xf32>,
    return
  }
  func.func @transform_0(%arg0: i32) -> (i32, i32, i32) {
    %c0_i32 = arith.constant 0 : i32
    %c0_i32_0 = arith.constant 0 : i32
    %c0_i32_1 = arith.constant 0 : i32
    return %arg0, %c0_i32, %c0_i32_0 : i32, i32, i32
  }
  func.func @transform_1(%arg0: i32) -> (i32, i32) {
    %c0_i32 = arith.constant 0 : i32
    %c0_i32_0 = arith.constant 0 : i32
    %c0_i32_1 = arith.constant 0 : i32
    return %c0_i32, %c0_i32_0 : i32, i32
  }
  func.func @transform_2(%arg0: i32) -> (i32, i32) {
    %c0_i32 = arith.constant 0 : i32
    %c0_i32_0 = arith.constant 0 : i32
    %c0_i32_1 = arith.constant 0 : i32
    return %c0_i32, %c0_i32_0 : i32, i32
  }
  func.func @transform_3(%arg0: i32) -> (i32, i32, i32) {
    %c0_i32 = arith.constant 0 : i32
    %c0_i32_0 = arith.constant 0 : i32
    %c0_i32_1 = arith.constant 0 : i32
    return %arg0, %c0_i32, %c0_i32_0 : i32, i32, i32
  }
}

</mosaic_0001>

<bundles_post_ra>
// kernel: tpu_custom_call.1
= control target key start
LH: loop header
LB: loop body
LE: loop exit
PB: predicated region body
PF: predicated region fallthrough
CT: control target
= control target key end

     0   :  { %8 = vsyncpa [#allocation5], 0  ;;  %s1664_s0 = inlined_call_operand.hbm [shape: f32[2,4,256], index: 0, kind: input, shape index: {}]   ;;  %s1665_s1 = inlined_call_operand.hbm [shape: bf16[8,36], index: 1, kind: input, shape index: {}]   ;;  %s1666_s2 = inlined_call_operand.vmem [shape: bf16[4,72], index: 2, kind: input, shape index: {}]   ;;  %s1667_s3 = inlined_call_operand.hbm [shape: f32[2,4,256], index: 3, kind: output, shape index: {}]  }
   0x1   :  { %10 = vsyncpa [#allocation5 + $0x1], 0 }
   0x2   :  { %11 = vsyncpa [#allocation8], 0 }
   0x3   :  { %12 = vsyncpa [#allocation6], 0 }
   0x4   :  { %14 = vsyncpa [#allocation6 + $0x1], 0  ;;  %s1297_s12 = smov 0   ;;  %s1299_s13 = smov 0  }
   0x5   :  { %s1301_s14 = smov 0   ;;  %s1303_s15 = smov 0  }
   0x6 LB: > { %s1318_s16 = sadd.s32 4294967295, %s1267_s15   ;;  %s904_s17 = sadd.s32 4294967294, %s1267_s15   ;;  %s1267_s15 = sphi %s1303_s15, %s1699_s15   ;;  %s1263_s14 = sphi %s1301_s14, %s1698_s14   ;;  %s1259_s13 = sphi %s1299_s13, %s1697_s13   ;;  %s1255_s12 = sphi %s1297_s12, %s1696_s12  }
   0x7   : > { %p40_p0 = scmp.ne.s32.totalorder %s1259_s13, %s1255_s12  ;;  %p1668_p1 = scmp.eq.s32.totalorder %s1318_s16, 0 }
   0x8   : > { %p112_p3 = scmp.eq.s32.totalorder %s904_s17, 1  ;;  %p905_p5 = scmp.ge.s32.totalorder %s1267_s15, 1 }
   0x9   : > { %p1327_p4 = por %p1668_p1, %p40_p0  ;;  %p119_p7 = scmp.lt.s32.totalorder %s1267_s15, 3 }
   0xa   : > { %p1332_p6 = por %p112_p3, %p40_p0  ;;  %s1269_s21 = smov [#allocation7]  }
   0xb   : > { %s1671_s18 = scalar_select %p1327_p4, 1, 0 }
   0xc   : > { %s1672_s19 = scalar_select %p1332_p6, 1, 0 }
   0xd   : > { %p1337_p8 = pnand %p905_p5, %p119_p7  ;;  %s132_s22 = sshll.u32 %s1269_s21, 4  ;;  %s133_s22 = int_to_ptr.vmem [resolvable:$true] %s132_s22 }
   0xe   : > { %s1345_s23 = sadd.s32 1, %s1267_s15   ;;  %s27_s27 = sadd.s32 1, %s1263_s14 }
   0xf   : > { %s1673_s20 = scalar_select %p1337_p8, 1, 0 }
  0x10   : > { %p996_p10 = pneg %p1337_p8  ;;  %s24_s25 = ssub.s32 %s1267_s15, %s1345_s23 }
  0x11   : > { %p1355_p12 = scmp.eq.s32.totalorder %s24_s25, 0  ;;  %s1139_s30 = scalar_lea.hbm %s1665_s1, 64 }
  0x12   : > { %p1349_p11 = pnand %p996_p10, %p1668_p1  ;;  %p1140_p0 = scmp.ne.s32.totalorder %s1665_s1, %s1139_s30 }
  0x13   : > { %s1675_s26 = scalar_select %p1355_p12, 1, 0 }
  0x14   : > { %p1141_p3 = pneg %p1349_p11  ;;  %p1146_p10 = scmp.lt.u32.totalorder %s1139_s30, %s1665_s1 }
  0x16   : > { %p1142_p5 = pnand %p1141_p3, %p1140_p0 }
  0x18   : > { %p1143_p7 = pneg %p1142_p5 }
  0x1a   : > { %p1148_p9 = pnand %p1146_p10, %p1143_p7 }
  0x1c   : > { %1151 = shalt.err (!%p1148_p9)
}
  0x1d   : > { %s1152_s8 = scalar_lea.vmem %s133_s22, 64  ;;  %p1160_p6 = scmp.lt.s32.totalorder %s133_s22, %s133_s22 }
  0x1e   : > { %p1153_p1 = scmp.ne.s32.totalorder %s133_s22, %s1152_s8  ;;  %p1161_p4 = scmp.lt.s32.totalorder %s1152_s8, %s1152_s8 }
  0x20   : > { %p1155_p2 = pnand %p1153_p1, %p1141_p3  ;;  %p1162_p8 = por %p1161_p4, %p1160_p6 }
  0x22   : > { %p1156_p13 = pneg %p1155_p2 }
  0x24   : > { %p1163_p12 = pnand %p1162_p8, %p1156_p13 }
  0x26   : > { %1166 = shalt.err (!%p1163_p12)
}
  0x27   : > { %999 = dma.hbm_to_vmem [thread:$0]  (!%p1349_p11), %s1665_s1, 64, %s133_s22, [#allocation8]  }
  0x28   : > { %p1676_p1 = scmp.ne.s32.totalorder %s1675_s26, 0  ;;  %p35_p2 = scmp.eq.s32.totalorder %s1267_s15, 0 }
  0x29   : > { %p1677_p4 = scmp.ne.s32.totalorder %s1263_s14, %s1259_s13  ;;  %p1678_p6 = scmp.eq.s32.totalorder %s1318_s16, 1 }
  0x2a   : > { %s1381_s11 = scalar_select %p1676_p1, %s1263_s14, %s27_s27  }
  0x2b   : > { %p1389_p8 = por %p1678_p6, %p1677_p4  ;;  %p1009_p9 = scmp.lt.s32.totalorder %s1267_s15, 2 }
  0x2c   : > { %s146_s21 = sand.u32 1, %s1263_s14   ;;  %p1680_p12 = pmov %p1677_p4 }
  0x2d   : > { %s908_s24 = sshll.u32 %s146_s21, 3  ;;  %s958_s25 = sshll.u32 %s1267_s15, 7 }
  0x2e   : > { %p36_p13 = por %p35_p2, %p1680_p12  ;;  %s1402_s22 = scalar_lea.hbm %s1664_s0, %s958_s25 }
  0x2f   : > { %s150_s26 = scalar_lea.vmem [#allocation4], %s908_s24  ;;  %s147_s4 = scalar_lea.sflag [#allocation5], %s146_s21 }
  0x30   : > { %s158_s27 = sshll.u32 %s150_s26, 4  ;;  %p1404_p11 = pnand %p1009_p9, %p36_p13  ;;  %s1408_s27 = int_to_ptr.vmem [resolvable:$true] %s158_s27 }
  0x31   : > { %s1167_s5 = scalar_lea.hbm %s1402_s22, 128  ;;  %s1172_s8 = scalar_lea.hbm %s1664_s0, 256 }
  0x32   : > { %p1168_p0 = scmp.ne.s32.totalorder %s1402_s22, %s1167_s5  ;;  %p1169_p3 = pneg %p1404_p11 }
  0x33   : > { %p1173_p10 = scmp.lt.u32.totalorder %s1402_s22, %s1664_s0  ;;  %p1174_p1 = scmp.lt.u32.totalorder %s1172_s8, %s1167_s5 }
  0x34   : > { %p1170_p5 = pnand %p1169_p3, %p1168_p0  ;;  %p1176_p4 = scmp.lt.u32.totalorder %s1167_s5, %s1402_s22 }
  0x35   : > { %p1175_p2 = por %p1174_p1, %p1173_p10 }
  0x36   : > { %p1171_p7 = pneg %p1170_p5 }
  0x37   : > { %p1177_p6 = por %p1176_p4, %p1175_p2 }
  0x39   : > { %p1178_p9 = pnand %p1177_p6, %p1171_p7 }
  0x3b   : > { %1181 = shalt.err (!%p1178_p9)
}
  0x3c   : > { %s1182_s21 = scalar_lea.vmem %s1408_s27, 128  ;;  %s1270_s24 = smov [#allocation4]  }
  0x3d   : > { %p1183_p12 = scmp.ne.s32.totalorder %s1408_s27, %s1182_s21  ;;  %s1187_s25 = sshll.u32 %s1270_s24, 4  ;;  %s1188_s25 = int_to_ptr.vmem [resolvable:$false] %s1187_s25 }
  0x3e   : > { %s1189_s28 = scalar_lea.vmem %s1188_s25, 256  ;;  %p1190_p5 = scmp.lt.s32.totalorder %s1408_s27, %s1188_s25 }
  0x3f   : > { %p1185_p13 = pnand %p1183_p12, %p1169_p3  ;;  %p1191_p10 = scmp.lt.s32.totalorder %s1189_s28, %s1182_s21 }
  0x41   : > { %p1186_p0 = pneg %p1185_p13  ;;  %p1192_p1 = por %p1191_p10, %p1190_p5 }
  0x43   : > { %p1193_p2 = pnand %p1192_p1, %p1186_p0 }
  0x45   : > { %1196 = shalt.err (!%p1193_p2)
}
  0x46   : > { %1003 = dma.hbm_to_vmem [thread:$0]  (!%p1404_p11), %s1402_s22, 128, %s1408_s27, %s147_s4  }
  0x47   : > { %p1682_p7 = scmp.ne.s32.totalorder %s1673_s20, 0 }
  0x48   : > { %s1438_s29 = sand.u32 (!%p1682_p7), 1, %s1259_s13   ;;  %p1683_p3 = scmp.ne.s32.totalorder (!%p1682_p7), %s1671_s18, 0 }
  0x49   : > { %167 = sbr.rel (%p1682_p7) target bundleno = 1067 (0x42b), region = 32  ;;  %s912_s26 = sshll.u32 (!%p1682_p7), %s1438_s29, 3 }
  0x4a   : > { %s170_s5 = scalar_lea.sflag (!%p1682_p7), [#allocation5], %s1438_s29  ;;  %s173_s6 = scalar_lea.vmem (!%p1682_p7), [#allocation4], %s912_s26 }
  0x50   : > { %1242 = dma.done.wait (%p1683_p3), %s170_s5, 128  }
  0x51   : > { %1244 = vsyncadd (%p1683_p3), %s170_s5, 4294967168  ;;  %p1684_p11 = scmp.eq.s32.totalorder %s1318_s16, 0 }
  0x53   : > { %1246 = dma.done.wait (%p1684_p11), [#allocation8], 64   ;;  %p1685_p4 = pmov %p1684_p11 }
  0x54   : > { %v1452_v0 = vld [vmem:[%s173_s6] sm:$0xff]  ;;  %s1271_s18 = smov 16   ;;  %s1272_s20 = smov 1   ;;  %v201_v5 = vlaneseq  ;;  %vm278_vm0 = vcmask 7168   ;;  %vm244_vm1 = vcmask 130048   ;;  %vm253_vm2 = vcmask 916480  }
  0x55   : > { %1248 = vsyncadd (%p1685_p4), [#allocation8], 4294967232  ;;  %v1456_v1 = vcombine.high %v1452_v0, %v1452_v0  ;;  %s1273_s22 = smov 112   ;;  %s1274_s27 = smov 127   ;;  %vm287_vm7 = vcmask 1039360   ;;  %v1275_v52 = vmov 0  }
  0x56   : > { %v1468_v6 = vand.u32 127, %v201_v5  ;;  %511 = vmatprep.mubr.bf16.mxu0 %v1275_v52  ;;  %795 = vmatprep.mubr.bf16.mxu1 %v1275_v52  ;;  %vm472_vm10 = vcmask 1041408   ;;  %vm468_vm11 = vcmask 293888   ;;  %vm756_vm12 = vcmask 1043456   ;;  %v697_v20 = vld [vmem:[%s1666_s2] sm:$0x3] }
  0x57   : > { %v1050_v2 = vpack.i.bf16 %v1452_v0, %v1456_v1  ;;  %v963_v3 = vpack.c.bf16 %v1456_v1, %v1452_v0  ;;  %v1055_v4 = vpack.i.bf16 %v1456_v1, %v1452_v0  ;;  %vm752_vm13 = vcmask 588800   ;;  %s977_s7 = sshll.u32 %s1318_s16, 7  ;;  %s199_s8 = scalar_lea.vmem [#allocation9], %s912_s26 }
  0x58   : > { %v1471_v7 = vadd.s32 128, %v1468_v6  ;;  %v208_v10 = vand.u32 15, %v1468_v6  ;;  %vm228_vm3 = vcmp.lt.s32.totalorder %v1468_v6, 16  ;;  %s824_s9 = sshll.u32 %s199_s8, 4  ;;  %s1620_s24 = scalar_lea.hbm %s1667_s3, %s977_s7  ;;  %s1622_s9 = int_to_ptr.vmem [resolvable:$true] %s824_s9 }
  0x59   : > { %1051 = vrot.lane.b32.xlu0 %v1050_v2, %s1271_s18  ;;  %398 = vst [vmem:[#allocation2 + $0x10] sm:$0x33] %v963_v3  ;;  %1061 = vrot.lane.b32.xlu1 %v1050_v2, %s1272_s20  ;;  %s810_s16 = scalar_lea.sflag [#allocation6], %s1438_s29  ;;  %s1197_s25 = scalar_lea.vmem %s1622_s9, 128 }
  0x5a   : > { %v215_v8 = vand.u32 15, %v1471_v7  ;;  %vm231_vm4 = vcmp.ge.s32.totalorder %v1471_v7, 240  ;;  %vm1483_vm6 = vcmp.eq.s32.totalorder %v208_v10, 0  ;;  %vm1493_vm9 = vcmp.eq.s32.totalorder %v208_v10, 15  ;;  %p1198_p6 = scmp.ne.s32.totalorder %s1622_s9, %s1197_s25  ;;  %s1276_s28 = smov [#allocation9]  }
  0x5b   : > { %s1201_s26 = sshll.u32 %s1276_s28, 4  ;;  %s1202_s26 = int_to_ptr.vmem [resolvable:$false] %s1201_s26 }
  0x5c   : > { %vm1477_vm5 = vcmp.eq.s32.totalorder %v215_v8, 0  ;;  %vm1489_vm8 = vcmp.eq.s32.totalorder %v215_v8, 15  ;;  %p1199_p9 = pnand %p1198_p6, %p1389_p8  ;;  %s1203_s5 = scalar_lea.vmem %s1202_s26, 256 }
  0x5d   : > { %1056 = vrot.lane.b32.xlu0 %v1055_v4, %s1273_s22  ;;  %1066 = vrot.lane.b32.xlu1 %v1055_v4, %s1274_s27  ;;  %p1204_p13 = scmp.lt.s32.totalorder %s1622_s9, %s1202_s26  ;;  %p1205_p0 = scmp.lt.s32.totalorder %s1203_s5, %s1197_s25 }
  0x5e   : > { %p1200_p12 = pneg %p1199_p9 }
  0x5f   : > { %p1206_p5 = por %p1205_p0, %p1204_p13 }
  0x61   : > { %p1207_p10 = pnand %p1206_p5, %p1200_p12 }
  0xcb   : > { %v1052_v9 = vpop.permute.xlu0 %1051  ;;  %v1062_v11 = vpop.permute.xlu1 %1061 }
  0xcc   : > { %v1064_v12 = vunpack.i.h.bf16 %v1062_v11  ;;  %v1063_v13 = vunpack.i.l.bf16 %v1062_v11  ;;  %v1054_v14 = vunpack.i.h.bf16 %v1052_v9  ;;  %v1053_v15 = vunpack.i.l.bf16 %v1052_v9 }
  0xce   : > { %v310_v18 = vsel %vm278_vm0, %v1064_v12, %v1063_v13  ;;  %v313_v19 = vsel %vm278_vm0, %v1063_v13, %v1064_v12  ;;  %v245_v26 = vsel %vm244_vm1, %v1054_v14, %v1053_v15  ;;  %v248_v27 = vsel %vm244_vm1, %v1053_v15, %v1054_v14 }
  0xcf   : > { %v1057_v17 = vpop.permute.xlu0 %1056  ;;  %v1067_v21 = vpop.permute.xlu1 %1066 }
  0xd0   : > { %v1059_v22 = vunpack.i.h.bf16 %v1057_v17  ;;  %v1058_v23 = vunpack.i.l.bf16 %v1057_v17  ;;  %v1069_v24 = vunpack.i.h.bf16 %v1067_v21  ;;  %v1068_v25 = vunpack.i.l.bf16 %v1067_v21 }
  0xd2   : > { %v254_v30 = vsel %vm253_vm2, %v1058_v23, %v1059_v22  ;;  %v258_v31 = vsel %vm253_vm2, %v1059_v22, %v1058_v23  ;;  %v318_v32 = vsel %vm287_vm7, %v1068_v25, %v1069_v24  ;;  %v322_v33 = vsel %vm287_vm7, %v1069_v24, %v1068_v25 }
  0xd3   : > { %v263_v34 = vsel %vm228_vm3, %v254_v30, %v248_v27  ;;  %v270_v35 = vsel %vm231_vm4, %v245_v26, %v258_v31  ;;  %v323_v36 = vsel %vm1483_vm6, %v318_v32, %v313_v19  ;;  %v324_v37 = vsel %vm1477_vm5, %v322_v33, %v310_v18 }
  0xd4   : > { %v1075_v38 = vpack.i.bf16 %v245_v26, %v263_v34  ;;  %v960_v39 = vpack.c.bf16 %v245_v26, %v263_v34  ;;  %v1070_v40 = vpack.i.bf16 %v263_v34, %v245_v26  ;;  %v966_v41 = vpack.c.bf16 %v270_v35, %v254_v30 }
  0xd5   : > { %v325_v42 = vsel %vm1493_vm9, %v313_v19, %v318_v32  ;;  %v326_v43 = vsel %vm1489_vm8, %v310_v18, %v322_v33  ;;  %v962_v45 = vpack.c.bf16 %v324_v37, %v323_v36  ;;  %v1085_v48 = vpack.i.bf16 %v270_v35, %v254_v30  ;;  %v437_v37 = vld [vmem:[#allocation7] sm:$0xf] }
  0xd6   : > { %1076 = vrot.lane.b32.xlu1 %v1075_v38, %s1274_s27  ;;  %v367_v44 = vrot.slane %v960_v39, 6  ;;  %1071 = vrot.lane.b32.xlu0 %v1070_v40, %s1272_s20  ;;  %v964_v46 = vpack.c.bf16 %v326_v43, %v325_v42  ;;  %v425_v47 = vrot.slane %v966_v41, 6  ;;  %v1080_v49 = vpack.i.bf16 %v254_v30, %v270_v35 }
  0xd7   : > { %v386_v50 = vrot.slane %v962_v45, 6 }
  0xd8   : > { %369 = vst [vmem:[#allocation2] sm:$0xcc] %v367_v44  ;;  %v406_v51 = vrot.slane %v964_v46, 6  ;;  %427 = vst [vmem:[#allocation2 + $0x18] sm:$0xcc] %v425_v47 }
  0xd9   : > { %388 = vst [vmem:[#allocation2 + $0x8] sm:$0xcc] %v386_v50 }
  0xda   : > { %1086 = vrot.lane.b32.xlu1 %v1085_v48, %s1274_s27  ;;  %1081 = vrot.lane.b32.xlu0 %v1080_v49, %s1272_s20  ;;  %408 = vst [vmem:[#allocation2 + $0x10] sm:$0xcc] %v406_v51 }
 0x148   : > { %v1077_v53 = vpop.permute.xlu1 %1076  ;;  %v1072_v54 = vpop.permute.xlu0 %1071 }
 0x149   : > { %v1079_v55 = vunpack.i.h.bf16 %v1077_v53  ;;  %v1078_v56 = vunpack.i.l.bf16 %v1077_v53  ;;  %v1074_v57 = vunpack.i.h.bf16 %v1072_v54  ;;  %v1073_v58 = vunpack.i.l.bf16 %v1072_v54 }
 0x14b   : > { %v288_v59 = vsel %vm287_vm7, %v1078_v56, %v1079_v55  ;;  %v292_v60 = vsel %vm287_vm7, %v1079_v55, %v1078_v56  ;;  %v279_v61 = vsel %vm278_vm0, %v1074_v57, %v1073_v58  ;;  %v282_v62 = vsel %vm278_vm0, %v1073_v58, %v1074_v57 }
 0x14c   : > { %v297_v63 = vsel %vm1483_vm6, %v288_v59, %v282_v62  ;;  %v298_v2 = vsel %vm1477_vm5, %v292_v60, %v279_v61  ;;  %v303_v3 = vsel %vm1493_vm9, %v282_v62, %v288_v59  ;;  %v304_v4 = vsel %vm1489_vm8, %v279_v61, %v292_v60  ;;  %v1087_v5 = vpop.permute.xlu1 %1086  ;;  %v1082_v8 = vpop.permute.xlu0 %1081 }
 0x14d   : > { %v959_v9 = vpack.c.bf16 %v298_v2, %v297_v63  ;;  %v961_v10 = vpack.c.bf16 %v304_v4, %v303_v3  ;;  %v1089_v11 = vunpack.i.h.bf16 %v1087_v5  ;;  %v1088_v12 = vunpack.i.l.bf16 %v1087_v5 }
 0x14e   : > { %v1084_v13 = vunpack.i.h.bf16 %v1082_v8  ;;  %v1083_v14 = vunpack.i.l.bf16 %v1082_v8 }
 0x14f   : > { %359 = vst [vmem:[#allocation2] sm:$0x33] %v959_v9  ;;  %378 = vst [vmem:[#allocation2 + $0x8] sm:$0x33] %v961_v10  ;;  %v342_v15 = vsel %vm287_vm7, %v1088_v12, %v1089_v11  ;;  %v346_v17 = vsel %vm287_vm7, %v1089_v11, %v1088_v12 }
 0x150   : > { %v334_v18 = vsel %vm278_vm0, %v1084_v13, %v1083_v14  ;;  %v337_v19 = vsel %vm278_vm0, %v1083_v14, %v1084_v13 }
 0x151   : > { %v347_v21 = vsel %vm1483_vm6, %v342_v15, %v337_v19  ;;  %v348_v22 = vsel %vm1477_vm5, %v346_v17, %v334_v18  ;;  %v349_v23 = vsel %vm1493_vm9, %v337_v19, %v342_v15  ;;  %v350_v24 = vsel %vm1489_vm8, %v334_v18, %v346_v17 }
 0x152   : > { %v965_v25 = vpack.c.bf16 %v348_v22, %v347_v21  ;;  %v967_v26 = vpack.c.bf16 %v350_v24, %v349_v23 }
 0x154   : > { %417 = vst [vmem:[#allocation2 + $0x18] sm:$0x33] %v965_v25  ;;  %436 = vst [vmem:[#allocation2 + $0x20] sm:$0x33] %v967_v26 }
 0x156   : > { %v1131_v27 = vld [vmem:[#allocation2 + $0x4] ss:$8 sps:$4 sm:$0xff]   ;;  %v1133_v30 = vld [vmem:[#allocation2] ss:$8 sps:$4 sm:$0xff]  }
 0x157   : > { %479 = vmatprep.subr.bf16.mxu0 %v1131_v27 }
 0x158   : > { %480 = vmatpush1.bf16.msra.mxu0 %v1133_v30 }
 0x15b   : > { %v1134_v31 = vld [vmem:[#allocation2 + $0x14] ss:$8 sps:$4 sm:$0xff]   ;;  %v1136_v32 = vld [vmem:[#allocation2 + $0x10] ss:$8 sps:$4 sm:$0xff]   ;;  %v442_v33 = vld [vmem:[#allocation2 + $0x20] sm:$0x33] }
 0x15c   : > { %481 = vmatprep.subr.bf16.mxu0 %v1134_v31  ;;  %v929_v34 = vcombine.high %v442_v33, %v442_v33  ;;  %v928_v35 = vcombine.low %v442_v33, %v442_v33 }
 0x15d   : > { %482 = vmatpush1.bf16.msra.mxu0 %v1136_v32 }
 0x15e   : > { %930 = vmatprep.subr.msk.bf16.mxu0 %vm472_vm10, %v929_v34  ;;  %v474_v36 = vsel %vm472_vm10, %v928_v35, 0 }
 0x161   : > { %484 = vmatpush1.bf16.msra.mxu0 %v474_v36 }
 0x164   : > { %931 = vmatmul.mubr.msk.bf16.vlgmr.msra.gmra.mrb[0].mxu0 %vm468_vm11, %v437_v37 }
 0x237   : > { %v513_v38 = vpop.f32.mrb[0].mxu0 }
 0x238   : > { %v1541_v39 = vmax.f32 %v513_v38, 0.0  ;;  %v515_v40 = vpop.f32.mrb[1].mxu0 }
 0x239   : > { %v1543_v41 = vmax.f32 %v515_v40, 0.0  ;;  %v517_v42 = vpop.f32.mrb[2].mxu0 }
 0x23a   : > { %v518_v43 = vpop.f32.mrb[3].mxu0 }
 0x23b   : > { %v1095_v44 = vpack.i.bf16 %v1543_v41, %v1541_v39  ;;  %v1090_v45 = vpack.i.bf16 %v1541_v39, %v1543_v41 }
 0x23d   : > { %1096 = vrot.lane.b32.xlu1 %v1095_v44, %s1273_s22  ;;  %1091 = vrot.lane.b32.xlu0 %v1090_v45, %s1271_s18 }
 0x2af   : > { %v1097_v46 = vpop.permute.xlu1 %1096  ;;  %v1092_v47 = vpop.permute.xlu0 %1091 }
 0x2b0   : > { %v1099_v48 = vunpack.i.h.bf16 %v1097_v46  ;;  %v1098_v49 = vunpack.i.l.bf16 %v1097_v46  ;;  %v1094_v50 = vunpack.i.h.bf16 %v1092_v47  ;;  %v1093_v51 = vunpack.i.l.bf16 %v1092_v47 }
 0x2b2   : > { %v1552_v52 = vsel %vm253_vm2, %v1098_v49, %v1099_v48  ;;  %v529_v53 = vsel %vm244_vm1, %v1094_v50, %v1093_v51  ;;  %v532_v54 = vsel %vm244_vm1, %v1093_v51, %v1094_v50  ;;  %v541_v58 = vsel %vm253_vm2, %v1099_v48, %v1098_v49 }
 0x2b3   : > { %v542_v55 = vsel %vm228_vm3, %v1552_v52, %v532_v54  ;;  %v545_v59 = vsel %vm231_vm4, %v529_v53, %v541_v58 }
 0x2b4   : > { %v1110_v56 = vpack.i.bf16 %v529_v53, %v542_v55  ;;  %v1100_v57 = vpack.i.bf16 %v542_v55, %v529_v53  ;;  %v1125_v60 = vpack.i.bf16 %v545_v59, %v1552_v52  ;;  %v1120_v6 = vpack.i.bf16 %v1552_v52, %v545_v59 }
 0x2b6   : > { %1111 = vrot.lane.b32.xlu1 %v1110_v56, %s1274_s27  ;;  %1101 = vrot.lane.b32.xlu0 %v1100_v57, %s1272_s20 }
 0x2ba   : > { %1116 = vrot.lane.b32.xlu1 %v1095_v44, %s1274_s27  ;;  %1106 = vrot.lane.b32.xlu0 %v1090_v45, %s1272_s20 }
 0x2be   : > { %1126 = vrot.lane.b32.xlu1 %v1125_v60, %s1274_s27  ;;  %1121 = vrot.lane.b32.xlu0 %v1120_v6, %s1272_s20 }
 0x328   : > { %v1112_v61 = vpop.permute.xlu1 %1111  ;;  %v1102_v62 = vpop.permute.xlu0 %1101 }
 0x329   : > { %v1114_v63 = vunpack.i.h.bf16 %v1112_v61  ;;  %v1113_v2 = vunpack.i.l.bf16 %v1112_v61  ;;  %v1104_v3 = vunpack.i.h.bf16 %v1102_v62  ;;  %v1103_v4 = vunpack.i.l.bf16 %v1102_v62 }
 0x32b   : > { %v553_v7 = vsel %vm278_vm0, %v1104_v3, %v1103_v4  ;;  %v565_v5 = vsel %vm287_vm7, %v1114_v63, %v1113_v2  ;;  %v556_v8 = vsel %vm278_vm0, %v1103_v4, %v1104_v3  ;;  %v561_v9 = vsel %vm287_vm7, %v1113_v2, %v1114_v63 }
 0x32c   : > { %v1117_v10 = vpop.permute.xlu1 %1116  ;;  %v1107_v11 = vpop.permute.xlu0 %1106  ;;  %v567_v12 = vsel %vm1477_vm5, %v565_v5, %v553_v7  ;;  %v566_v13 = vsel %vm1483_vm6, %v561_v9, %v556_v8  ;;  %v569_v22 = vsel %vm1489_vm8, %v553_v7, %v565_v5  ;;  %v568_v32 = vsel %vm1493_vm9, %v556_v8, %v561_v9 }
 0x32d   : > { %v1119_v14 = vunpack.i.h.bf16 %v1117_v10  ;;  %v1118_v15 = vunpack.i.l.bf16 %v1117_v10  ;;  %v1109_v17 = vunpack.i.h.bf16 %v1107_v11  ;;  %v1108_v18 = vunpack.i.l.bf16 %v1107_v11 }
 0x32e   : > { %v979_v19 = vpack.c.bf16 %v529_v53, %v567_v12  ;;  %v978_v21 = vpack.c.bf16 %v542_v55, %v566_v13 }
 0x32f   : > { %v583_v23 = vsel %vm287_vm7, %v1118_v15, %v1119_v14  ;;  %v587_v24 = vsel %vm287_vm7, %v1119_v14, %v1118_v15  ;;  %v575_v25 = vsel %vm278_vm0, %v1109_v17, %v1108_v18  ;;  %v578_v26 = vsel %vm278_vm0, %v1108_v18, %v1109_v17 }
 0x330   : > { %763 = vmatprep.subr.bf16.mxu1 %v979_v19  ;;  %v1127_v27 = vpop.permute.xlu1 %1126  ;;  %v1122_v30 = vpop.permute.xlu0 %1121  ;;  %v589_v31 = vsel %vm1477_vm5, %v587_v24, %v575_v25  ;;  %v588_v33 = vsel %vm1483_vm6, %v583_v23, %v578_v26  ;;  %v591_v34 = vsel %vm1489_vm8, %v575_v25, %v587_v24  ;;  %v590_v46 = vsel %vm1493_vm9, %v578_v26, %v583_v23 }
 0x331   : > { %764 = vmatpush1.bf16.msra.mxu1 %v978_v21  ;;  %v1129_v35 = vunpack.i.h.bf16 %v1127_v27  ;;  %v1128_v36 = vunpack.i.l.bf16 %v1127_v27  ;;  %v1124_v37 = vunpack.i.h.bf16 %v1122_v30  ;;  %v1123_v38 = vunpack.i.l.bf16 %v1122_v30 }
 0x332   : > { %v981_v40 = vpack.c.bf16 %v589_v31, %v569_v22  ;;  %v980_v42 = vpack.c.bf16 %v588_v33, %v568_v32  ;;  %v983_v45 = vpack.c.bf16 %v591_v34, %v1543_v41  ;;  %v982_v50 = vpack.c.bf16 %v590_v46, %v1541_v39 }
 0x333   : > { %v611_v43 = vsel %vm287_vm7, %v1129_v35, %v1128_v36  ;;  %v599_v44 = vsel %vm278_vm0, %v1124_v37, %v1123_v38  ;;  %v607_v47 = vsel %vm287_vm7, %v1128_v36, %v1129_v35  ;;  %v602_v48 = vsel %vm278_vm0, %v1123_v38, %v1124_v37 }
 0x334   : > { %765 = vmatprep.subr.bf16.mxu1 %v981_v40  ;;  %v613_v49 = vsel %vm1477_vm5, %v611_v43, %v599_v44  ;;  %v612_v53 = vsel %vm1483_vm6, %v607_v47, %v602_v48  ;;  %v615_v41 = vsel %vm1489_vm8, %v599_v44, %v611_v43  ;;  %v614_v54 = vsel %vm1493_vm9, %v602_v48, %v607_v47 }
 0x335   : > { %766 = vmatpush1.bf16.msra.mxu1 %v980_v42  ;;  %v985_v51 = vpack.c.bf16 %v545_v59, %v613_v49  ;;  %v984_v16 = vpack.c.bf16 %v1552_v52, %v612_v53  ;;  %v987_v55 = vpack.c.bf16 %v615_v41, %v615_v41  ;;  %v986_v56 = vpack.c.bf16 %v614_v54, %v614_v54 }
 0x336   : > { %767 = vmatprep.subr.bf16.mxu1 %v983_v45 }
 0x337   : > { %v758_v39 = vsel %vm756_vm12, %v986_v56, 0 }
 0x339   : > { %768 = vmatpush1.bf16.msra.mxu1 %v982_v50 }
 0x33a   : > { %769 = vmatprep.subr.bf16.mxu1 %v985_v51 }
 0x33d   : > { %770 = vmatpush1.bf16.msra.mxu1 %v984_v16 }
 0x33e   : > { %951 = vmatprep.subr.msk.bf16.mxu1 %vm756_vm12, %v987_v55 }
 0x341   : > { %772 = vmatpush1.bf16.msra.mxu1 %v758_v39 }
 0x344   : > { %952 = vmatmul.mubr.msk.bf16.vlgmr.msra.gmra.mrb[0].mxu1 %vm752_vm13, %v697_v20 }
 0x417   : > { %v797_v28 = vpop.f32.mrb[0].mxu1 }
 0x418   : > { %v798_v29 = vadd.f32 %v797_v28, %v1452_v0  ;;  %v799_v57 = vpop.f32.mrb[1].mxu1 }
 0x419   : > { %v800_v52 = vadd.f32 %v799_v57, %v1456_v1  ;;  %v801_v58 = vpop.f32.mrb[2].mxu1 }
 0x41a   : > { %v802_v59 = vpop.f32.mrb[3].mxu1 }
 0x41b   : > { %v806_v60 = vcombine.low %v798_v29, %v800_v52 }
 0x41d   : > { %808 = vst [vmem:[%s199_s8] sm:$0xff] %v806_v60 }
 0x41e   : > { %1210 = shalt.err (!%p1207_p10)
}
 0x41f   : > { %s1211_s29 = scalar_lea.hbm %s1620_s24, 128  ;;  %s1215_s20 = scalar_lea.hbm %s1667_s3, 256 }
 0x420   : > { %p1212_p1 = scmp.ne.s32.totalorder %s1620_s24, %s1211_s29  ;;  %p1216_p3 = scmp.lt.u32.totalorder %s1620_s24, %s1667_s3 }
 0x421   : > { %p1217_p11 = scmp.lt.u32.totalorder %s1215_s20, %s1211_s29  ;;  %p1219_p6 = scmp.lt.u32.totalorder %s1211_s29, %s1620_s24 }
 0x422   : > { %p1213_p2 = pnand %p1212_p1, %p1389_p8 }
 0x423   : > { %p1218_p4 = por %p1217_p11, %p1216_p3 }
 0x424   : > { %p1214_p7 = pneg %p1213_p2 }
 0x425   : > { %p1220_p9 = por %p1219_p6, %p1218_p4 }
 0x427   : > { %p1221_p12 = pnand %p1220_p9, %p1214_p7 }
 0x429   : > { %1224 = shalt.err (!%p1221_p12)
}
 0x42a   : > { %994 = dma.vmem_to_hbm [thread:$0]  (%p1389_p8), %s1622_s9, 128, %s1620_s24, %s810_s16  }
 0x42b PF: > { %s836_s30 = sand.u32 1, %s1255_s12   ;;  %p1694_p13 = scmp.ne.s32.totalorder %s1672_s19, 0 }
 0x42c   : > { %p1695_p0 = scmp.ge.s32.totalorder %s1267_s15, 2  ;;  %s837_s4 = scalar_lea.sflag [#allocation6], %s836_s30 }
 0x42e   : > { %p1005_p5 = pnand %p1695_p0, %p1694_p13 }
 0x430   : > { %1250 = dma.done.wait (!%p1005_p5), %s837_s4, 128  }
 0x431   : > { %1252 = vsyncadd (!%p1005_p5), %s837_s4, 4294967168  ;;  %p17_p10 = scmp.ge.s32.totalorder %s1345_s23, 4   ;;  %s1696_s12 = smov %s1259_s13 }
 0x432   : > { %s1697_s13 = smov %s1263_s14  ;;  %s1698_s14 = smov %s1381_s11 }
 0x433   : > { %s1699_s15 = smov %s1345_s23  ;;  %19 = sbr.rel (!%p17_p10) target bundleno = 6 (0x6), region = 81 }
 0x43a   :  { %842 = vsyncpa [#allocation5], 1 }
 0x43b   :  { %844 = vsyncpa [#allocation5 + $0x1], 1 }
 0x43c   :  { %845 = vsyncpa [#allocation8], 1 }
 0x43d   :  { %846 = vsyncpa [#allocation6], 1 }
 0x43e   :  { %848 = vsyncpa [#allocation6 + $0x1], 1 }

</bundles_post_ra>
